<compile_context>
chip_gen: v7x
topology: tpu7x:2x2x1
jax: 0.10.0
libtpu: 0.0.40
codegen_flags: <defaults>
</compile_context>

<pallas_src>
from functools import partial

import jax
import jax.numpy as jnp
from jax.experimental import pallas as pl
from jax.experimental.pallas import tpu as pltpu

LANES = 128          # common padded output width (max layer width)
KPAD = 16            # bf16 sublane granule for the contraction axis


def layer_dims(input_dim):
    # input_dim -> 128 -> 128 -> 64 -> 64 -> 32 -> 32 -> 16 -> 16
    #           -> 8 -> 8 -> 4 -> 4 -> 2 -> 2 -> 1
    return [input_dim, 128, 128, 64, 64, 32, 32, 16, 16, 8, 8, 4, 4, 2, 2, 1]


def _round_up(n, m):
    return ((n + m - 1) // m) * m


def make_mlp_kernel(input_dim, kpads):
    """Build the statically-unrolled 15-layer kernel.

    x_ref: (TB, input_dim) f32
    w_ref: (sum(kpads), 128) bf16  -- per-layer (kpad_l, 128) slabs, stacked
    b_ref: (n_layers, 1, 128) f32
    o_ref: (TB, 128) f32           -- true output in column 0
    """
    n_layers = len(kpads)
    k0 = kpads[0]

    def kernel(x_ref, w_ref, b_ref, o_ref):
        h = x_ref[...]                                   # (TB, input_dim) f32
        if input_dim < k0:                               # static pad to sublane granule
            pad = jnp.zeros((h.shape[0], k0 - input_dim), jnp.float32)
            h = jnp.concatenate([h, pad], axis=1)

        off = 0
        for l in range(n_layers):
            k = kpads[l]
            w = w_ref[off:off + k, :]                    # (k, 128) bf16, static slice
            a = h[:, :k].astype(jnp.bfloat16)            # trim K, cast for MXU
            acc = jnp.dot(a, w, preferred_element_type=jnp.float32)
            acc = acc + b_ref[l]                         # (1,128) f32 bias, VPU add
            h = jnp.maximum(acc, 0.0) if l < n_layers - 1 else acc
            off += k
        o_ref[...] = h

    return kernel


def init_params(key, input_dim):
    """PyTorch nn.Linear-style init (uniform +/- 1/sqrt(fan_in)).

    Returns:
      w_slab: (sum(kpads), 128) bf16 packed weights (K trimmed, lanes padded)
      b_pad:  (n_layers, 1, 128) f32 padded biases
      kpads:  per-layer padded contraction sizes (static metadata)
      ws, bs: unpadded f32 weights/biases for the reference check
    """
    dims = layer_dims(input_dim)
    n_layers = len(dims) - 1
    kpads = [_round_up(dims[l], KPAD) for l in range(n_layers)]
    k_total = sum(kpads)

    w_slab = jnp.zeros((k_total, LANES), jnp.float32)
    b_pad = jnp.zeros((n_layers, 1, LANES), jnp.float32)
    ws, bs = [], []
    off = 0
    for l in range(n_layers):
        fan_in, fan_out = dims[l], dims[l + 1]
        key, kw, kb = jax.random.split(key, 3)
        bound = 1.0 / (fan_in ** 0.5)
        w = jax.random.uniform(kw, (fan_in, fan_out), jnp.float32, -bound, bound)
        b = jax.random.uniform(kb, (fan_out,), jnp.float32, -bound, bound)
        ws.append(w)
        bs.append(b)
        w_slab = w_slab.at[off:off + fan_in, :fan_out].set(w)
        b_pad = b_pad.at[l, 0, :fan_out].set(b)
        off += kpads[l]
    return w_slab.astype(jnp.bfloat16), b_pad, kpads, ws, bs


@partial(jax.jit, static_argnames=("kpads", "tb"))
def mlp_forward(x, w_slab, b_pad, kpads, tb=16):
    """x: (B, input_dim) f32 -> (B, 1) f32."""
    B, input_dim = x.shape
    n_layers, _, lanes = b_pad.shape
    if B % tb != 0 or B < tb:
        tb = B                      # fall back to a single full-batch block
    grid = (B // tb,)

    kernel = make_mlp_kernel(input_dim, list(kpads))
    out_p = pl.pallas_call(
        kernel,
        out_shape=jax.ShapeDtypeStruct((B, lanes), jnp.float32),
        grid=grid,
        in_specs=[
            pl.BlockSpec((tb, input_dim), lambda i: (i, 0)),       # batch-tiled x
            pl.BlockSpec(w_slab.shape, lambda i: (0, 0)),          # resident weights
            pl.BlockSpec(b_pad.shape, lambda i: (0, 0, 0)),        # resident biases
        ],
        out_specs=pl.BlockSpec((tb, lanes), lambda i: (i, 0)),     # lane-dense output
        compiler_params=pltpu.CompilerParams(
            dimension_semantics=("parallel",)),                    # megacore on v7x
    )(x, w_slab, b_pad)
    return out_p[:, :1]


def mlp_reference(x, ws, bs):
    """Mirrors the kernel math: bf16 matmul operands, f32 accumulation."""
    h = x
    for l, (w, b) in enumerate(zip(ws, bs)):
        h = jnp.dot(h.astype(jnp.bfloat16), w.astype(jnp.bfloat16),
                    preferred_element_type=jnp.float32) + b
        if l < len(ws) - 1:
            h = jnp.maximum(h, 0.0)
    return h


if __name__ == "__main__":
    key = jax.random.PRNGKey(0)
    batch, input_dim = 32, 32
    k_x, k_p = jax.random.split(key)
    x = jax.random.normal(k_x, (batch, input_dim), jnp.float32)

    w_slab, b_pad, kpads, ws, bs = init_params(k_p, input_dim)

    out = mlp_forward(x, w_slab, b_pad, tuple(kpads), tb=16)
    out = jax.block_until_ready(out)

    ref = mlp_reference(x, ws, bs)
    assert out.shape == (batch, 1), out.shape
    assert jnp.allclose(out, ref, atol=1e-3, rtol=1e-3), (out, ref)
    print("KERNEL_OK")
</pallas_src>

<mosaic_0001>
module attributes {stable_mosaic.version = 11 : i64} {
  func.func @kernel(%arg0: i32, %arg1: memref<16x32xf32, #tpu.memory_space<vmem>>, %arg2: memref<608x128xbf16, #tpu.memory_space<vmem>>, %arg3: memref<15x1x128xf32, #tpu.memory_space<vmem>>, %arg4: memref<16x128xf32, #tpu.memory_space<vmem>>) attributes {dimension_semantics = [#tpu.dimension_semantics<parallel>], iteration_bounds = array<i64: 2>, scalar_prefetch = 0 : i64, scratch_operands = 0 : i64, tpu.core_type = #tpu.core_type<tc>, window_params = [{transform_indices = @transform_0, window_bounds = array<i64: 16, 32>}, {pipeline_mode = #tpu.pipeline_mode<synchronous>, transform_indices = @transform_1, window_bounds = array<i64: 608, 128>}, {pipeline_mode = #tpu.pipeline_mode<synchronous>, transform_indices = @transform_2, window_bounds = array<i64: 15, 1, 128>}, {transform_indices = @transform_3, window_bounds = array<i64: 16, 128>}]} {
    %c0 = arith.constant 0 : index
    %c0_0 = arith.constant 0 : index
    %0 = vector.load %arg1[%c0, %c0_0] : memref<16x32xf32, #tpu.memory_space<vmem>>, vector<16x32xf32>
    %c0_1 = arith.constant 0 : index
    %c0_2 = arith.constant 0 : index
    %1 = vector.load %arg2[%c0_1, %c0_2] : memref<608x128xbf16, #tpu.memory_space<vmem>>, vector<32x128xbf16>
    %2 = arith.truncf %0 : vector<16x32xf32> to vector<16x32xbf16>
    %cst = arith.constant dense<0.000000e+00> : vector<16x128xf32>
    %3 = tpu.matmul %2, %1, %cst {dimension_numbers = #tpu.dot_dimension_numbers<[1], [0], [0], [1], [0, 0, 1, 1], [], []>} : vector<16x32xbf16>, vector<32x128xbf16>, vector<16x128xf32> -> vector<16x128xf32>
    %c0_3 = arith.constant 0 : index
    %c0_4 = arith.constant 0 : index
    %c0_5 = arith.constant 0 : index
    %4 = vector.load %arg3[%c0_3, %c0_4, %c0_5] : memref<15x1x128xf32, #tpu.memory_space<vmem>>, vector<1x1x128xf32>
    %5 = vector.shape_cast %4 : vector<1x1x128xf32> to vector<1x128xf32>
    %6 = vector.broadcast %5 : vector<1x128xf32> to vector<16x128xf32>
    %7 = arith.addf %3, %6 : vector<16x128xf32>
    %cst_6 = arith.constant 0.000000e+00 : f32
    %8 = vector.broadcast %cst_6 : f32 to vector<16x128xf32>
    %9 = arith.maximumf %7, %8 : vector<16x128xf32>
    %c32 = arith.constant 32 : index
    %c0_7 = arith.constant 0 : index
    %10 = vector.load %arg2[%c32, %c0_7] : memref<608x128xbf16, #tpu.memory_space<vmem>>, vector<128x128xbf16>
    %11 = arith.truncf %9 : vector<16x128xf32> to vector<16x128xbf16>
    %cst_8 = arith.constant dense<0.000000e+00> : vector<16x128xf32>
    %12 = tpu.matmul %11, %10, %cst_8 {dimension_numbers = #tpu.dot_dimension_numbers<[1], [0], [0], [1], [0, 0, 1, 1], [], []>} : vector<16x128xbf16>, vector<128x128xbf16>, vector<16x128xf32> -> vector<16x128xf32>
    %c1 = arith.constant 1 : index
    %c0_9 = arith.constant 0 : index
    %c0_10 = arith.constant 0 : index
    %13 = vector.load %arg3[%c1, %c0_9, %c0_10] : memref<15x1x128xf32, #tpu.memory_space<vmem>>, vector<1x1x128xf32>
    %14 = vector.shape_cast %13 : vector<1x1x128xf32> to vector<1x128xf32>
    %15 = vector.broadcast %14 : vector<1x128xf32> to vector<16x128xf32>
    %16 = arith.addf %12, %15 : vector<16x128xf32>
    %cst_11 = arith.constant 0.000000e+00 : f32
    %17 = vector.broadcast %cst_11 : f32 to vector<16x128xf32>
    %18 = arith.maximumf %16, %17 : vector<16x128xf32>
    %c160 = arith.constant 160 : index
    %c0_12 = arith.constant 0 : index
    %19 = vector.load %arg2[%c160, %c0_12] : memref<608x128xbf16, #tpu.memory_space<vmem>>, vector<128x128xbf16>
    %20 = arith.truncf %18 : vector<16x128xf32> to vector<16x128xbf16>
    %cst_13 = arith.constant dense<0.000000e+00> : vector<16x128xf32>
    %21 = tpu.matmul %20, %19, %cst_13 {dimension_numbers = #tpu.dot_dimension_numbers<[1], [0], [0], [1], [0, 0, 1, 1], [], []>} : vector<16x128xbf16>, vector<128x128xbf16>, vector<16x128xf32> -> vector<16x128xf32>
    %c2 = arith.constant 2 : index
    %c0_14 = arith.constant 0 : index
    %c0_15 = arith.constant 0 : index
    %22 = vector.load %arg3[%c2, %c0_14, %c0_15] : memref<15x1x128xf32, #tpu.memory_space<vmem>>, vector<1x1x128xf32>
    %23 = vector.shape_cast %22 : vector<1x1x128xf32> to vector<1x128xf32>
    %24 = vector.broadcast %23 : vector<1x128xf32> to vector<16x128xf32>
    %25 = arith.addf %21, %24 : vector<16x128xf32>
    %cst_16 = arith.constant 0.000000e+00 : f32
    %26 = vector.broadcast %cst_16 : f32 to vector<16x128xf32>
    %27 = arith.maximumf %25, %26 : vector<16x128xf32>
    %c288 = arith.constant 288 : index
    %c0_17 = arith.constant 0 : index
    %28 = vector.load %arg2[%c288, %c0_17] : memref<608x128xbf16, #tpu.memory_space<vmem>>, vector<64x128xbf16>
    %29 = vector.extract_strided_slice %27 {offsets = [0, 0], sizes = [16, 64], strides = [1, 1]} : vector<16x128xf32> to vector<16x64xf32>
    %30 = arith.truncf %29 : vector<16x64xf32> to vector<16x64xbf16>
    %cst_18 = arith.constant dense<0.000000e+00> : vector<16x128xf32>
    %31 = tpu.matmul %30, %28, %cst_18 {dimension_numbers = #tpu.dot_dimension_numbers<[1], [0], [0], [1], [0, 0, 1, 1], [], []>} : vector<16x64xbf16>, vector<64x128xbf16>, vector<16x128xf32> -> vector<16x128xf32>
    %c3 = arith.constant 3 : index
    %c0_19 = arith.constant 0 : index
    %c0_20 = arith.constant 0 : index
    %32 = vector.load %arg3[%c3, %c0_19, %c0_20] : memref<15x1x128xf32, #tpu.memory_space<vmem>>, vector<1x1x128xf32>
    %33 = vector.shape_cast %32 : vector<1x1x128xf32> to vector<1x128xf32>
    %34 = vector.broadcast %33 : vector<1x128xf32> to vector<16x128xf32>
    %35 = arith.addf %31, %34 : vector<16x128xf32>
    %cst_21 = arith.constant 0.000000e+00 : f32
    %36 = vector.broadcast %cst_21 : f32 to vector<16x128xf32>
    %37 = arith.maximumf %35, %36 : vector<16x128xf32>
    %c352 = arith.constant 352 : index
    %c0_22 = arith.constant 0 : index
    %38 = vector.load %arg2[%c352, %c0_22] : memref<608x128xbf16, #tpu.memory_space<vmem>>, vector<64x128xbf16>
    %39 = vector.extract_strided_slice %37 {offsets = [0, 0], sizes = [16, 64], strides = [1, 1]} : vector<16x128xf32> to vector<16x64xf32>
    %40 = arith.truncf %39 : vector<16x64xf32> to vector<16x64xbf16>
    %cst_23 = arith.constant dense<0.000000e+00> : vector<16x128xf32>
    %41 = tpu.matmul %40, %38, %cst_23 {dimension_numbers = #tpu.dot_dimension_numbers<[1], [0], [0], [1], [0, 0, 1, 1], [], []>} : vector<16x64xbf16>, vector<64x128xbf16>, vector<16x128xf32> -> vector<16x128xf32>
    %c4 = arith.constant 4 : index
    %c0_24 = arith.constant 0 : index
    %c0_25 = arith.constant 0 : index
    %42 = vector.load %arg3[%c4, %c0_24, %c0_25] : memref<15x1x128xf32, #tpu.memory_space<vmem>>, vector<1x1x128xf32>
    %43 = vector.shape_cast %42 : vector<1x1x128xf32> to vector<1x128xf32>
    %44 = vector.broadcast %43 : vector<1x128xf32> to vector<16x128xf32>
    %45 = arith.addf %41, %44 : vector<16x128xf32>
    %cst_26 = arith.constant 0.000000e+00 : f32
    %46 = vector.broadcast %cst_26 : f32 to vector<16x128xf32>
    %47 = arith.maximumf %45, %46 : vector<16x128xf32>
    %c416 = arith.constant 416 : index
    %c0_27 = arith.constant 0 : index
    %48 = vector.load %arg2[%c416, %c0_27] : memref<608x128xbf16, #tpu.memory_space<vmem>>, vector<32x128xbf16>
    %49 = vector.extract_strided_slice %47 {offsets = [0, 0], sizes = [16, 32], strides = [1, 1]} : vector<16x128xf32> to vector<16x32xf32>
    %50 = arith.truncf %49 : vector<16x32xf32> to vector<16x32xbf16>
    %cst_28 = arith.constant dense<0.000000e+00> : vector<16x128xf32>
    %51 = tpu.matmul %50, %48, %cst_28 {dimension_numbers = #tpu.dot_dimension_numbers<[1], [0], [0], [1], [0, 0, 1, 1], [], []>} : vector<16x32xbf16>, vector<32x128xbf16>, vector<16x128xf32> -> vector<16x128xf32>
    %c5 = arith.constant 5 : index
    %c0_29 = arith.constant 0 : index
    %c0_30 = arith.constant 0 : index
    %52 = vector.load %arg3[%c5, %c0_29, %c0_30] : memref<15x1x128xf32, #tpu.memory_space<vmem>>, vector<1x1x128xf32>
    %53 = vector.shape_cast %52 : vector<1x1x128xf32> to vector<1x128xf32>
    %54 = vector.broadcast %53 : vector<1x128xf32> to vector<16x128xf32>
    %55 = arith.addf %51, %54 : vector<16x128xf32>
    %cst_31 = arith.constant 0.000000e+00 : f32
    %56 = vector.broadcast %cst_31 : f32 to vector<16x128xf32>
    %57 = arith.maximumf %55, %56 : vector<16x128xf32>
    %c448 = arith.constant 448 : index
    %c0_32 = arith.constant 0 : index
    %58 = vector.load %arg2[%c448, %c0_32] : memref<608x128xbf16, #tpu.memory_space<vmem>>, vector<32x128xbf16>
    %59 = vector.extract_strided_slice %57 {offsets = [0, 0], sizes = [16, 32], strides = [1, 1]} : vector<16x128xf32> to vector<16x32xf32>
    %60 = arith.truncf %59 : vector<16x32xf32> to vector<16x32xbf16>
    %cst_33 = arith.constant dense<0.000000e+00> : vector<16x128xf32>
    %61 = tpu.matmul %60, %58, %cst_33 {dimension_numbers = #tpu.dot_dimension_numbers<[1], [0], [0], [1], [0, 0, 1, 1], [], []>} : vector<16x32xbf16>, vector<32x128xbf16>, vector<16x128xf32> -> vector<16x128xf32>
    %c6 = arith.constant 6 : index
    %c0_34 = arith.constant 0 : index
    %c0_35 = arith.constant 0 : index
    %62 = vector.load %arg3[%c6, %c0_34, %c0_35] : memref<15x1x128xf32, #tpu.memory_space<vmem>>, vector<1x1x128xf32>
    %63 = vector.shape_cast %62 : vector<1x1x128xf32> to vector<1x128xf32>
    %64 = vector.broadcast %63 : vector<1x128xf32> to vector<16x128xf32>
    %65 = arith.addf %61, %64 : vector<16x128xf32>
    %cst_36 = arith.constant 0.000000e+00 : f32
    %66 = vector.broadcast %cst_36 : f32 to vector<16x128xf32>
    %67 = arith.maximumf %65, %66 : vector<16x128xf32>
    %c480 = arith.constant 480 : index
    %c0_37 = arith.constant 0 : index
    %68 = vector.load %arg2[%c480, %c0_37] : memref<608x128xbf16, #tpu.memory_space<vmem>>, vector<16x128xbf16>
    %69 = vector.extract_strided_slice %67 {offsets = [0, 0], sizes = [16, 16], strides = [1, 1]} : vector<16x128xf32> to vector<16x16xf32>
    %70 = arith.truncf %69 : vector<16x16xf32> to vector<16x16xbf16>
    %cst_38 = arith.constant dense<0.000000e+00> : vector<16x128xf32>
    %71 = tpu.matmul %70, %68, %cst_38 {dimension_numbers = #tpu.dot_dimension_numbers<[1], [0], [0], [1], [0, 0, 1, 1], [], []>} : vector<16x16xbf16>, vector<16x128xbf16>, vector<16x128xf32> -> vector<16x128xf32>
    %c7 = arith.constant 7 : index
    %c0_39 = arith.constant 0 : index
    %c0_40 = arith.constant 0 : index
    %72 = vector.load %arg3[%c7, %c0_39, %c0_40] : memref<15x1x128xf32, #tpu.memory_space<vmem>>, vector<1x1x128xf32>
    %73 = vector.shape_cast %72 : vector<1x1x128xf32> to vector<1x128xf32>
    %74 = vector.broadcast %73 : vector<1x128xf32> to vector<16x128xf32>
    %75 = arith.addf %71, %74 : vector<16x128xf32>
    %cst_41 = arith.constant 0.000000e+00 : f32
    %76 = vector.broadcast %cst_41 : f32 to vector<16x128xf32>
    %77 = arith.maximumf %75, %76 : vector<16x128xf32>
    %c496 = arith.constant 496 : index
    %c0_42 = arith.constant 0 : index
    %78 = vector.load %arg2[%c496, %c0_42] : memref<608x128xbf16, #tpu.memory_space<vmem>>, vector<16x128xbf16>
    %79 = vector.extract_strided_slice %77 {offsets = [0, 0], sizes = [16, 16], strides = [1, 1]} : vector<16x128xf32> to vector<16x16xf32>
    %80 = arith.truncf %79 : vector<16x16xf32> to vector<16x16xbf16>
    %cst_43 = arith.constant dense<0.000000e+00> : vector<16x128xf32>
    %81 = tpu.matmul %80, %78, %cst_43 {dimension_numbers = #tpu.dot_dimension_numbers<[1], [0], [0], [1], [0, 0, 1, 1], [], []>} : vector<16x16xbf16>, vector<16x128xbf16>, vector<16x128xf32> -> vector<16x128xf32>
    %c8 = arith.constant 8 : index
    %c0_44 = arith.constant 0 : index
    %c0_45 = arith.constant 0 : index
    %82 = vector.load %arg3[%c8, %c0_44, %c0_45] : memref<15x1x128xf32, #tpu.memory_space<vmem>>, vector<1x1x128xf32>
    %83 = vector.shape_cast %82 : vector<1x1x128xf32> to vector<1x128xf32>
    %84 = vector.broadcast %83 : vector<1x128xf32> to vector<16x128xf32>
    %85 = arith.addf %81, %84 : vector<16x128xf32>
    %cst_46 = arith.constant 0.000000e+00 : f32
    %86 = vector.broadcast %cst_46 : f32 to vector<16x128xf32>
    %87 = arith.maximumf %85, %86 : vector<16x128xf32>
    %c512 = arith.constant 512 : index
    %c0_47 = arith.constant 0 : index
    %88 = vector.load %arg2[%c512, %c0_47] : memref<608x128xbf16, #tpu.memory_space<vmem>>, vector<16x128xbf16>
    %89 = vector.extract_strided_slice %87 {offsets = [0, 0], sizes = [16, 16], strides = [1, 1]} : vector<16x128xf32> to vector<16x16xf32>
    %90 = arith.truncf %89 : vector<16x16xf32> to vector<16x16xbf16>
    %cst_48 = arith.constant dense<0.000000e+00> : vector<16x128xf32>
    %91 = tpu.matmul %90, %88, %cst_48 {dimension_numbers = #tpu.dot_dimension_numbers<[1], [0], [0], [1], [0, 0, 1, 1], [], []>} : vector<16x16xbf16>, vector<16x128xbf16>, vector<16x128xf32> -> vector<16x128xf32>
    %c9 = arith.constant 9 : index
    %c0_49 = arith.constant 0 : index
    %c0_50 = arith.constant 0 : index
    %92 = vector.load %arg3[%c9, %c0_49, %c0_50] : memref<15x1x128xf32, #tpu.memory_space<vmem>>, vector<1x1x128xf32>
    %93 = vector.shape_cast %92 : vector<1x1x128xf32> to vector<1x128xf32>
    %94 = vector.broadcast %93 : vector<1x128xf32> to vector<16x128xf32>
    %95 = arith.addf %91, %94 : vector<16x128xf32>
    %cst_51 = arith.constant 0.000000e+00 : f32
    %96 = vector.broadcast %cst_51 : f32 to vector<16x128xf32>
    %97 = arith.maximumf %95, %96 : vector<16x128xf32>
    %c528 = arith.constant 528 : index
    %c0_52 = arith.constant 0 : index
    %98 = vector.load %arg2[%c528, %c0_52] : memref<608x128xbf16, #tpu.memory_space<vmem>>, vector<16x128xbf16>
    %99 = vector.extract_strided_slice %97 {offsets = [0, 0], sizes = [16, 16], strides = [1, 1]} : vector<16x128xf32> to vector<16x16xf32>
    %100 = arith.truncf %99 : vector<16x16xf32> to vector<16x16xbf16>
    %cst_53 = arith.constant dense<0.000000e+00> : vector<16x128xf32>
    %101 = tpu.matmul %100, %98, %cst_53 {dimension_numbers = #tpu.dot_dimension_numbers<[1], [0], [0], [1], [0, 0, 1, 1], [], []>} : vector<16x16xbf16>, vector<16x128xbf16>, vector<16x128xf32> -> vector<16x128xf32>
    %c10 = arith.constant 10 : index
    %c0_54 = arith.constant 0 : index
    %c0_55 = arith.constant 0 : index
    %102 = vector.load %arg3[%c10, %c0_54, %c0_55] : memref<15x1x128xf32, #tpu.memory_space<vmem>>, vector<1x1x128xf32>
    %103 = vector.shape_cast %102 : vector<1x1x128xf32> to vector<1x128xf32>
    %104 = vector.broadcast %103 : vector<1x128xf32> to vector<16x128xf32>
    %105 = arith.addf %101, %104 : vector<16x128xf32>
    %cst_56 = arith.constant 0.000000e+00 : f32
    %106 = vector.broadcast %cst_56 : f32 to vector<16x128xf32>
    %107 = arith.maximumf %105, %106 : vector<16x128xf32>
    %c544 = arith.constant 544 : index
    %c0_57 = arith.constant 0 : index
    %108 = vector.load %arg2[%c544, %c0_57] : memref<608x128xbf16, #tpu.memory_space<vmem>>, vector<16x128xbf16>
    %109 = vector.extract_strided_slice %107 {offsets = [0, 0], sizes = [16, 16], strides = [1, 1]} : vector<16x128xf32> to vector<16x16xf32>
    %110 = arith.truncf %109 : vector<16x16xf32> to vector<16x16xbf16>
    %cst_58 = arith.constant dense<0.000000e+00> : vector<16x128xf32>
    %111 = tpu.matmul %110, %108, %cst_58 {dimension_numbers = #tpu.dot_dimension_numbers<[1], [0], [0], [1], [0, 0, 1, 1], [], []>} : vector<16x16xbf16>, vector<16x128xbf16>, vector<16x128xf32> -> vector<16x128xf32>
    %c11 = arith.constant 11 : index
    %c0_59 = arith.constant 0 : index
    %c0_60 = arith.constant 0 : index
    %112 = vector.load %arg3[%c11, %c0_59, %c0_60] : memref<15x1x128xf32, #tpu.memory_space<vmem>>, vector<1x1x128xf32>
    %113 = vector.shape_cast %112 : vector<1x1x128xf32> to vector<1x128xf32>
    %114 = vector.broadcast %113 : vector<1x128xf32> to vector<16x128xf32>
    %115 = arith.addf %111, %114 : vector<16x128xf32>
    %cst_61 = arith.constant 0.000000e+00 : f32
    %116 = vector.broadcast %cst_61 : f32 to vector<16x128xf32>
    %117 = arith.maximumf %115, %116 : vector<16x128xf32>
    %c560 = arith.constant 560 : index
    %c0_62 = arith.constant 0 : index
    %118 = vector.load %arg2[%c560, %c0_62] : memref<608x128xbf16, #tpu.memory_space<vmem>>, vector<16x128xbf16>
    %119 = vector.extract_strided_slice %117 {offsets = [0, 0], sizes = [16, 16], strides = [1, 1]} : vector<16x128xf32> to vector<16x16xf32>
    %120 = arith.truncf %119 : vector<16x16xf32> to vector<16x16xbf16>
    %cst_63 = arith.constant dense<0.000000e+00> : vector<16x128xf32>
    %121 = tpu.matmul %120, %118, %cst_63 {dimension_numbers = #tpu.dot_dimension_numbers<[1], [0], [0], [1], [0, 0, 1, 1], [], []>} : vector<16x16xbf16>, vector<16x128xbf16>, vector<16x128xf32> -> vector<16x128xf32>
    %c12 = arith.constant 12 : index
    %c0_64 = arith.constant 0 : index
    %c0_65 = arith.constant 0 : index
    %122 = vector.load %arg3[%c12, %c0_64, %c0_65] : memref<15x1x128xf32, #tpu.memory_space<vmem>>, vector<1x1x128xf32>
    %123 = vector.shape_cast %122 : vector<1x1x128xf32> to vector<1x128xf32>
    %124 = vector.broadcast %123 : vector<1x128xf32> to vector<16x128xf32>
    %125 = arith.addf %121, %124 : vector<16x128xf32>
    %cst_66 = arith.constant 0.000000e+00 : f32
    %126 = vector.broadcast %cst_66 : f32 to vector<16x128xf32>
    %127 = arith.maximumf %125, %126 : vector<16x128xf32>
    %c576 = arith.constant 576 : index
    %c0_67 = arith.constant 0 : index
    %128 = vector.load %arg2[%c576, %c0_67] : memref<608x128xbf16, #tpu.memory_space<vmem>>, vector<16x128xbf16>
    %129 = vector.extract_strided_slice %127 {offsets = [0, 0], sizes = [16, 16], strides = [1, 1]} : vector<16x128xf32> to vector<16x16xf32>
    %130 = arith.truncf %129 : vector<16x16xf32> to vector<16x16xbf16>
    %cst_68 = arith.constant dense<0.000000e+00> : vector<16x128xf32>
    %131 = tpu.matmul %130, %128, %cst_68 {dimension_numbers = #tpu.dot_dimension_numbers<[1], [0], [0], [1], [0, 0, 1, 1], [], []>} : vector<16x16xbf16>, vector<16x128xbf16>, vector<16x128xf32> -> vector<16x128xf32>
    %c13 = arith.constant 13 : index
    %c0_69 = arith.constant 0 : index
    %c0_70 = arith.constant 0 : index
    %132 = vector.load %arg3[%c13, %c0_69, %c0_70] : memref<15x1x128xf32, #tpu.memory_space<vmem>>, vector<1x1x128xf32>
    %133 = vector.shape_cast %132 : vector<1x1x128xf32> to vector<1x128xf32>
    %134 = vector.broadcast %133 : vector<1x128xf32> to vector<16x128xf32>
    %135 = arith.addf %131, %134 : vector<16x128xf32>
    %cst_71 = arith.constant 0.000000e+00 : f32
    %136 = vector.broadcast %cst_71 : f32 to vector<16x128xf32>
    %137 = arith.maximumf %135, %136 : vector<16x128xf32>
    %c592 = arith.constant 592 : index
    %c0_72 = arith.constant 0 : index
    %138 = vector.load %arg2[%c592, %c0_72] : memref<608x128xbf16, #tpu.memory_space<vmem>>, vector<16x128xbf16>
    %139 = vector.extract_strided_slice %137 {offsets = [0, 0], sizes = [16, 16], strides = [1, 1]} : vector<16x128xf32> to vector<16x16xf32>
    %140 = arith.truncf %139 : vector<16x16xf32> to vector<16x16xbf16>
    %cst_73 = arith.constant dense<0.000000e+00> : vector<16x128xf32>
    %141 = tpu.matmul %140, %138, %cst_73 {dimension_numbers = #tpu.dot_dimension_numbers<[1], [0], [0], [1], [0, 0, 1, 1], [], []>} : vector<16x16xbf16>, vector<16x128xbf16>, vector<16x128xf32> -> vector<16x128xf32>
    %c14 = arith.constant 14 : index
    %c0_74 = arith.constant 0 : index
    %c0_75 = arith.constant 0 : index
    %142 = vector.load %arg3[%c14, %c0_74, %c0_75] : memref<15x1x128xf32, #tpu.memory_space<vmem>>, vector<1x1x128xf32>
    %143 = vector.shape_cast %142 : vector<1x1x128xf32> to vector<1x128xf32>
    %144 = vector.broadcast %143 : vector<1x128xf32> to vector<16x128xf32>
    %145 = arith.addf %141, %144 : vector<16x128xf32>
    %c0_76 = arith.constant 0 : index
    %c0_77 = arith.constant 0 : index
    %146 = vector.load %arg4[%c0_76, %c0_77] : memref<16x128xf32, #tpu.memory_space<vmem>>, vector<16x128xf32>
    tpu.vector_store %arg4[%c0_76, %c0_77], %145 {strides = array<i32>} : memref<16x128xf32, #tpu.memory_space<vmem>>, vector<16x128xf32>,
    return
  }
  func.func @transform_0(%arg0: i32) -> (i32, i32) {
    %c0_i32 = arith.constant 0 : i32
    %c0_i32_0 = arith.constant 0 : i32
    return %arg0, %c0_i32 : i32, i32
  }
  func.func @transform_1(%arg0: i32) -> (i32, i32) {
    %c0_i32 = arith.constant 0 : i32
    %c0_i32_0 = arith.constant 0 : i32
    %c0_i32_1 = arith.constant 0 : i32
    return %c0_i32, %c0_i32_0 : i32, i32
  }
  func.func @transform_2(%arg0: i32) -> (i32, i32, i32) {
    %c0_i32 = arith.constant 0 : i32
    %c0_i32_0 = arith.constant 0 : i32
    %c0_i32_1 = arith.constant 0 : i32
    %c0_i32_2 = arith.constant 0 : i32
    return %c0_i32, %c0_i32_0, %c0_i32_1 : i32, i32, i32
  }
  func.func @transform_3(%arg0: i32) -> (i32, i32) {
    %c0_i32 = arith.constant 0 : i32
    %c0_i32_0 = arith.constant 0 : i32
    return %arg0, %c0_i32 : i32, i32
  }
}

</mosaic_0001>

<bundles_post_ra>
// kernel: mlp_forward.1
= control target key start
LH: loop header
LB: loop body
LE: loop exit
PB: predicated region body
PF: predicated region fallthrough
CT: control target
= control target key end

     0   :  { %8 = vsyncpa [#allocation3], 0  ;;  %s2232_s0 = inlined_call_operand.hbm [shape: f32[32,32], index: 0, kind: input, shape index: {}]   ;;  %s2233_s1 = inlined_call_operand.hbm [shape: bf16[608,128], index: 1, kind: input, shape index: {}]   ;;  %s2234_s2 = inlined_call_operand.hbm [shape: f32[15,1,128], index: 2, kind: input, shape index: {}]   ;;  %s2235_s3 = inlined_call_operand.vmem [shape: f32[32,128], index: 3, kind: output, shape index: {}]  }
   0x1   :  { %10 = vsyncpa [#allocation3 + $0x1], 0 }
   0x2   :  { %11 = vsyncpa [#allocation5], 0  ;;  %s1972_s12 = smov 0   ;;  %s1974_s13 = smov 0  }
   0x3   :  { %s1976_s14 = smov 0   ;;  %s1978_s15 = smov 0  }
   0x4 LB: > { %s1436_s16 = sadd.s32 4294967295, %s1939_s15   ;;  %p37_p0 = scmp.ne.s32.totalorder %s1931_s13, %s1927_s12  ;;  %s1939_s15 = sphi %s1978_s15, %s2251_s15   ;;  %s1935_s14 = sphi %s1976_s14, %s2250_s14   ;;  %s1931_s13 = sphi %s1974_s13, %s2249_s13   ;;  %s1927_s12 = sphi %s1972_s12, %s2248_s12  }
   0x5   : > { %p1994_p1 = scmp.eq.s32.totalorder %s1436_s16, 0  ;;  %p1438_p2 = scmp.ge.s32.totalorder %s1939_s15, 1 }
   0x6   : > { %p116_p3 = scmp.lt.s32.totalorder %s1939_s15, 3  ;;  %s1941_s20 = smov [#allocation4]  }
   0x7   : > { %s2240_s17 = scalar_select %p1994_p1, 1, 0 }
   0x8   : > { %p2002_p4 = por %p1994_p1, %p37_p0  ;;  %p2006_p5 = pnand %p1438_p2, %p116_p3 }
   0x9   : > { %s128_s21 = sshll.u32 %s1941_s20, 4  ;;  %s1942_s23 = smov [#allocation6]   ;;  %s129_s21 = int_to_ptr.vmem [resolvable:$true] %s128_s21 }
   0xa   : > { %s2241_s18 = scalar_select %p2002_p4, 1, 0 }
   0xb   : > { %s2242_s19 = scalar_select %p2006_p5, 1, 0 }
   0xc   : > { %p1719_p6 = pneg %p2006_p5  ;;  %s141_s24 = sshll.u32 %s1942_s23, 4  ;;  %s2018_s24 = int_to_ptr.vmem [resolvable:$true] %s141_s24 }
   0xd   : > { %s1815_s27 = scalar_lea.hbm %s2233_s1, 4864 }
   0xe   : > { %p2014_p7 = pnand %p1719_p6, %p1994_p1  ;;  %p1816_p8 = scmp.ne.s32.totalorder %s2233_s1, %s1815_s27 }
   0xf   : > { %p1822_p12 = scmp.lt.u32.totalorder %s1815_s27, %s2233_s1 }
  0x10   : > { %p1817_p9 = pneg %p2014_p7 }
  0x12   : > { %p1818_p10 = pnand %p1817_p9, %p1816_p8 }
  0x14   : > { %p1819_p11 = pneg %p1818_p10 }
  0x16   : > { %p1824_p13 = pnand %p1822_p12, %p1819_p11 }
  0x18   : > { %1827 = shalt.err (!%p1824_p13)
}
  0x19   : > { %s1828_s5 = scalar_lea.vmem %s129_s21, 4864  ;;  %p1836_p6 = scmp.lt.s32.totalorder %s129_s21, %s129_s21 }
  0x1a   : > { %p1829_p0 = scmp.ne.s32.totalorder %s129_s21, %s1828_s5  ;;  %p1837_p1 = scmp.lt.s32.totalorder %s1828_s5, %s1828_s5 }
  0x1c   : > { %p1831_p2 = pnand %p1829_p0, %p1817_p9  ;;  %p1838_p4 = por %p1837_p1, %p1836_p6 }
  0x1e   : > { %p1832_p3 = pneg %p1831_p2 }
  0x20   : > { %p1839_p5 = pnand %p1838_p4, %p1832_p3 }
  0x22   : > { %1842 = shalt.err (!%p1839_p5)
}
  0x23   : > { %s1943_s6 = smov 64   ;;  %s1944_s7 = smov 4  }
  0x24   : > { %1722 = dma.hbm_to_vmem [thread:$0]  (!%p2014_p7), %s2233_s1, 4864, %s129_s21, [#allocation5], %s1943_s6, %s1943_s6, %s1944_s7  }
  0x25   : > { %s1843_s12 = scalar_lea.hbm %s2234_s2, 240 }
  0x26   : > { %p1844_p8 = scmp.ne.s32.totalorder %s2234_s2, %s1843_s12  ;;  %p1850_p5 = scmp.lt.u32.totalorder %s1843_s12, %s2234_s2 }
  0x28   : > { %p1846_p1 = pnand %p1844_p8, %p1817_p9 }
  0x2a   : > { %p1847_p4 = pneg %p1846_p1 }
  0x2c   : > { %p1852_p10 = pnand %p1850_p5, %p1847_p4 }
  0x2e   : > { %1855 = shalt.err (!%p1852_p10)
}
  0x2f   : > { %s1856_s21 = scalar_lea.vmem %s2018_s24, 240  ;;  %s1863_s27 = scalar_lea.vmem %s2018_s24, 256 }
  0x30   : > { %p1857_p11 = scmp.ne.s32.totalorder %s2018_s24, %s1856_s21  ;;  %p1864_p0 = scmp.lt.s32.totalorder %s2018_s24, %s2018_s24 }
  0x31   : > { %p1865_p2 = scmp.lt.s32.totalorder %s1863_s27, %s1856_s21 }
  0x32   : > { %p1859_p12 = pnand %p1857_p11, %p1817_p9 }
  0x33   : > { %p1866_p3 = por %p1865_p2, %p1864_p0 }
  0x34   : > { %p1860_p13 = pneg %p1859_p12 }
  0x36   : > { %p1867_p6 = pnand %p1866_p3, %p1860_p13 }
  0x38   : > { %1870 = shalt.err (!%p1867_p6)
}
  0x39   : > { %s1945_s28 = smov 16   ;;  %s1946_s29 = smov 1  }
  0x3a   : > { %1725 = dma.hbm_to_vmem [thread:$0]  (!%p2014_p7), %s2234_s2, 240, %s2018_s24, [#allocation5], %s1945_s28, %s1945_s28, %s1946_s29  }
  0x3b   : > { %s2069_s5 = sadd.s32 1, %s1939_s15   ;;  %s24_s7 = sadd.s32 1, %s1935_s14 }
  0x3c   : > { %s21_s6 = ssub.s32 %s1939_s15, %s2069_s5  ;;  %p31_p8 = scmp.ne.s32.totalorder %s1935_s14, %s1931_s13 }
  0x3d   : > { %p22_p9 = scmp.eq.s32.totalorder %s21_s6, 0  ;;  %p32_p1 = scmp.eq.s32.totalorder %s1939_s15, 0 }
  0x3e   : > { %p1732_p5 = scmp.lt.s32.totalorder %s1939_s15, 2  ;;  %s155_s9 = sand.u32 1, %s1935_s14  }
  0x3f   : > { %s2078_s8 = scalar_select %p22_p9, %s1935_s14, %s24_s7  }
  0x40   : > { %p33_p4 = por %p32_p1, %p31_p8  ;;  %s1519_s10 = sshll.u32 %s1939_s15, 8 }
  0x41   : > { %s1442_s11 = sshll.u32 %s155_s9, 4  ;;  %s2086_s20 = scalar_lea.hbm %s2232_s0, %s1519_s10 }
  0x42   : > { %s159_s24 = scalar_lea.vmem [#allocation2], %s1442_s11  ;;  %p2088_p7 = pnand %p1732_p5, %p33_p4 }
  0x43   : > { %s166_s23 = sshll.u32 %s159_s24, 4  ;;  %s2094_s26 = scalar_lea.sflag [#allocation3], %s155_s9  ;;  %s2092_s23 = int_to_ptr.vmem [resolvable:$true] %s166_s23 }
  0x44   : > { %s1871_s21 = scalar_lea.hbm %s2086_s20, 256  ;;  %p1873_p11 = pneg %p2088_p7 }
  0x45   : > { %p1872_p10 = scmp.ne.s32.totalorder %s2086_s20, %s1871_s21  ;;  %s1876_s29 = scalar_lea.hbm %s2232_s0, 512 }
  0x46   : > { %p1877_p0 = scmp.lt.u32.totalorder %s2086_s20, %s2232_s0  ;;  %p1878_p2 = scmp.lt.u32.totalorder %s1876_s29, %s1871_s21 }
  0x47   : > { %p1874_p12 = pnand %p1873_p11, %p1872_p10  ;;  %p1880_p6 = scmp.lt.u32.totalorder %s1871_s21, %s2086_s20 }
  0x48   : > { %p1879_p3 = por %p1878_p2, %p1877_p0 }
  0x49   : > { %p1875_p13 = pneg %p1874_p12 }
  0x4a   : > { %p1881_p9 = por %p1880_p6, %p1879_p3 }
  0x4c   : > { %p1882_p8 = pnand %p1881_p9, %p1875_p13 }
  0x4e   : > { %1885 = shalt.err (!%p1882_p8)
}
  0x4f   : > { %s1886_s6 = scalar_lea.vmem %s2092_s23, 256  ;;  %s1947_s7 = smov [#allocation2]  }
  0x50   : > { %p1887_p1 = scmp.ne.s32.totalorder %s2092_s23, %s1886_s6  ;;  %s1891_s9 = sshll.u32 %s1947_s7, 4  ;;  %s1892_s9 = int_to_ptr.vmem [resolvable:$false] %s1891_s9 }
  0x51   : > { %s1893_s10 = scalar_lea.vmem %s1892_s9, 512  ;;  %p1894_p10 = scmp.lt.s32.totalorder %s2092_s23, %s1892_s9 }
  0x52   : > { %p1889_p4 = pnand %p1887_p1, %p1873_p11  ;;  %p1895_p12 = scmp.lt.s32.totalorder %s1893_s10, %s1886_s6 }
  0x54   : > { %p1890_p5 = pneg %p1889_p4  ;;  %p1896_p0 = por %p1895_p12, %p1894_p10 }
  0x56   : > { %p1897_p2 = pnand %p1896_p0, %p1890_p5 }
  0x58   : > { %1900 = shalt.err (!%p1897_p2)
}
  0x59   : > { %s1948_s11 = smov 128   ;;  %s1949_s22 = smov 8  }
  0x5a   : > { %1729 = dma.hbm_to_vmem [thread:$0]  (!%p2088_p7), %s2086_s20, 256, %s2092_s23, %s2094_s26, %s1948_s11, %s1948_s11, %s1949_s22  }
  0x5b   : > { %p2245_p11 = scmp.ne.s32.totalorder %s2242_s19, 0 }
  0x5c   : > { %s180_s12 = sand.u32 (!%p2245_p11), 1, %s1931_s13   ;;  %p2246_p13 = scmp.ne.s32.totalorder (!%p2245_p11), %s2241_s18, 0 }
  0x5d   : > { %178 = sbr.rel (%p2245_p11) target bundleno = 3411 (0xd53), region = 32  ;;  %s1446_s24 = sshll.u32 (!%p2245_p11), %s180_s12, 4 }
  0x5e   : > { %s181_s21 = scalar_lea.sflag (!%p2245_p11), [#allocation3], %s180_s12  ;;  %s184_s27 = scalar_lea.vmem (!%p2245_p11), [#allocation2], %s1446_s24 }
  0x64   : > { %1918 = dma.done.wait (%p2246_p13), %s181_s21, 256  }
  0x65   : > { %1920 = vsyncadd (%p2246_p13), %s181_s21, 4294967040  ;;  %p2247_p3 = scmp.ne.s32.totalorder %s2240_s17, 0 }
  0x67   : > { %1922 = dma.done.wait (%p2247_p3), [#allocation5], 5104  }
  0x68   : > { %1924 = vsyncadd (%p2247_p3), [#allocation5], 4294962192  ;;  %v1950_v0 = vmov 0.0   ;;  %vm1951_vm0 = vmmov 0   ;;  %v1777_v1 = vld [vmem:[#allocation4] sm:$0xff]   ;;  %v1778_v2 = vld [vmem:[#allocation4 + $0x8] sm:$0xff]  }
  0x69   : > { %1573 = vmatprep.subr.bf16.mxu0 %v1950_v0  ;;  %1577 = vmatprep.mubr.msk.bf16.mxu0 %vm1951_vm0, %v1950_v0  ;;  %v223_v3 = vld [vmem:[%s184_s27] sm:$0xff]  ;;  %v224_v4 = vld [vmem:[%s184_s27 + $0x8] sm:$0xff]  ;;  %vm249_vm1 = vcmask 261120   ;;  %vm569_vm2 = vcmask 523264   ;;  %vm862_vm3 = vcmask 130048   ;;  %s1449_s17 = sshll.u32 %s1436_s16, 1 }
  0x6a   : > { %1581 = vmatprep.subr.bf16.mxu1 %v1950_v0  ;;  %1597 = vmatprep.mubr.msk.bf16.mxu1 %vm1951_vm0, %v1950_v0  ;;  %v1779_v5 = vld [vmem:[#allocation4 + $0x10] sm:$0xff]   ;;  %v229_v6 = vpack.c.bf16 %v224_v4, %v223_v3  ;;  %v1780_v7 = vld [vmem:[#allocation4 + $0x18] sm:$0xff]   ;;  %v1781_v8 = vld [vmem:[#allocation4 + $0x20] sm:$0xff]   ;;  %p217_p7 = scmp.lt.s32.totalorder %s1449_s17, 3 }
  0x6b   : > { %1574 = vmatpush3.bf16.msra.mxu0 %v1777_v1  ;;  %1582 = vmatpush3.bf16.msra.mxu1 %v1779_v5  ;;  %v1782_v9 = vld [vmem:[#allocation4 + $0x28] sm:$0xff]   ;;  %v1783_v10 = vld [vmem:[#allocation4 + $0x30] sm:$0xff]   ;;  %v1784_v11 = vld [vmem:[#allocation4 + $0x38] sm:$0xff]  }
  0x6c   : > { %1575 = vmatprep.subr.bf16.mxu0 %v1950_v0  ;;  %1583 = vmatprep.subr.bf16.mxu1 %v1950_v0  ;;  %v1785_v12 = vld [vmem:[#allocation4 + $0x40] sm:$0xff]   ;;  %v1786_v13 = vld [vmem:[#allocation4 + $0x48] sm:$0xff]   ;;  %v1787_v14 = vld [vmem:[#allocation4 + $0x50] sm:$0xff]   ;;  %s2253_s17 = smov (!%p217_p7, %s1449_s17), 3 }
  0x6d   : > { %v1788_v15 = vld [vmem:[#allocation4 + $0x58] sm:$0xff]   ;;  %v1789_v16 = vld [vmem:[#allocation4 + $0x60] sm:$0xff]   ;;  %v1790_v17 = vld [vmem:[#allocation4 + $0x68] sm:$0xff]   ;;  %s1450_s18 = sshll.u32 %s2253_s17, 3 }
  0x6e   : > { %v1791_v18 = vld [vmem:[#allocation4 + $0x70] sm:$0xff]   ;;  %v1792_v19 = vld [vmem:[#allocation4 + $0x78] sm:$0xff]   ;;  %v1793_v30 = vld [vmem:[#allocation4 + $0x80] sm:$0xff]   ;;  %s220_s23 = scalar_lea.vmem %s2235_s3, %s1450_s18 }
  0x6f   : > { %1576 = vmatpush3.bf16.msra.mxu0 %v1778_v2  ;;  %1584 = vmatpush3.bf16.msra.mxu1 %v1780_v7  ;;  %v1451_v20 = vld [vmem:[#allocation6] ss:$0 sm:$0xff]  ;;  %v1794_v31 = vld [vmem:[#allocation4 + $0x88] sm:$0xff]   ;;  %v1796_v33 = vld [vmem:[#allocation4 + $0x98] sm:$0xff]  }
  0x70   : > { %1601 = vmatprep.subr.bf16.mxu0 %v1950_v0  ;;  %1585 = vmatprep.subr.bf16.mxu1 %v1950_v0  ;;  %v1795_v32 = vld [vmem:[#allocation4 + $0x90] sm:$0xff]   ;;  %v1797_v44 = vld [vmem:[#allocation4 + $0xa0] sm:$0xff]   ;;  %v1798_v45 = vld [vmem:[#allocation4 + $0xa8] sm:$0xff]  }
  0x71   : > { %v1455_v34 = vld [vmem:[#allocation6 + $0x1] ss:$0 sm:$0xff]  ;;  %v1800_v47 = vld [vmem:[#allocation4 + $0xb8] sm:$0xff]   ;;  %v1464_v48 = vld [vmem:[#allocation6 + $0x2] ss:$0 sm:$0xff] }
  0x72   : > { %1578 = vmatmul.mubr.msk.bf16.vlgmr.msra.gmra.mrb[0].mxu0 %vm249_vm1, %v229_v6  ;;  %v1799_v46 = vld [vmem:[#allocation4 + $0xb0] sm:$0xff]   ;;  %v1801_v58 = vld [vmem:[#allocation4 + $0xc0] sm:$0xff]   ;;  %v1802_v59 = vld [vmem:[#allocation4 + $0xc8] sm:$0xff]  }
  0x73   : > { %1617 = vmatprep.mubr.msk.bf16.mxu0 %vm1951_vm0, %v1950_v0  ;;  %1586 = vmatpush3.bf16.msra.mxu1 %v1781_v8  ;;  %v1473_v60 = vld [vmem:[#allocation6 + $0x3] ss:$0 sm:$0xff]  ;;  %v1804_v8 = vld [vmem:[#allocation4 + $0xd8] sm:$0xff]  }
  0x74   : > { %1587 = vmatprep.subr.bf16.mxu1 %v1950_v0  ;;  %1602 = vmatpush3.bf16.msra.mxu0 %v1787_v14  ;;  %v1803_v7 = vld [vmem:[#allocation4 + $0xd0] sm:$0xff]  }
  0x75   : > { %1603 = vmatprep.subr.bf16.mxu0 %v1950_v0 }
  0x77   : > { %1588 = vmatpush3.bf16.msra.mxu1 %v1782_v9  ;;  %v1479_v9 = vld [vmem:[#allocation6 + $0x4] ss:$0 sm:$0xff] }
  0x78   : > { %1589 = vmatprep.subr.bf16.mxu1 %v1950_v0  ;;  %1604 = vmatpush3.bf16.msra.mxu0 %v1788_v15 }
  0x79   : > { %1605 = vmatprep.subr.bf16.mxu0 %v1950_v0 }
  0x7b   : > { %1590 = vmatpush3.bf16.msra.mxu1 %v1783_v10 }
  0x7c   : > { %1591 = vmatprep.subr.bf16.mxu1 %v1950_v0  ;;  %1606 = vmatpush3.bf16.msra.mxu0 %v1789_v16 }
  0x7d   : > { %1607 = vmatprep.subr.bf16.mxu0 %v1950_v0 }
  0x7f   : > { %1592 = vmatpush3.bf16.msra.mxu1 %v1784_v11 }
  0x80   : > { %1593 = vmatprep.subr.bf16.mxu1 %v1950_v0  ;;  %1608 = vmatpush3.bf16.msra.mxu0 %v1790_v17 }
  0x81   : > { %1609 = vmatprep.subr.bf16.mxu0 %v1950_v0 }
  0x83   : > { %1594 = vmatpush3.bf16.msra.mxu1 %v1785_v12 }
  0x84   : > { %1595 = vmatprep.subr.bf16.mxu1 %v1950_v0  ;;  %1610 = vmatpush3.bf16.msra.mxu0 %v1791_v18 }
  0x85   : > { %1611 = vmatprep.subr.bf16.mxu0 %v1950_v0 }
  0x87   : > { %1596 = vmatpush3.bf16.msra.mxu1 %v1786_v13 }
  0x88   : > { %1621 = vmatprep.subr.bf16.mxu1 %v1950_v0  ;;  %1612 = vmatpush3.bf16.msra.mxu0 %v1792_v19  ;;  %v1805_v19 = vld [vmem:[#allocation4 + $0xe0] sm:$0xff]  }
  0x89   : > { %1613 = vmatprep.subr.bf16.mxu0 %v1950_v0 }
  0x8c   : > { %1614 = vmatpush3.bf16.msra.mxu0 %v1793_v30 }
  0x8d   : > { %1615 = vmatprep.subr.bf16.mxu0 %v1950_v0 }
  0x90   : > { %1616 = vmatpush3.bf16.msra.mxu0 %v1794_v31  ;;  %v1807_v31 = vld [vmem:[#allocation4 + $0xf0] sm:$0xff]  }
  0x91   : > { %1633 = vmatprep.subr.bf16.mxu0 %v1950_v0 }
 0x145   : > { %v287_v21 = vpop.f32.mrb[0].mxu0 }
 0x146   : > { %v288_v22 = vadd.f32 %v1451_v20, %v287_v21  ;;  %v1579_v23 = vpop.f32.mrb[1].mxu0  ;;  %v1485_v21 = vld [vmem:[#allocation6 + $0x5] ss:$0 sm:$0xff] }
 0x147   : > { %v290_v24 = vpop.f32.mrb[2].mxu0 }
 0x148   : > { %v291_v25 = vadd.f32 %v1451_v20, %v290_v24  ;;  %v1580_v26 = vpop.f32.mrb[3].mxu0  ;;  %v294_v27 = vmax.f32 %v288_v22, 0.0  ;;  %v1806_v20 = vld [vmem:[#allocation4 + $0xe8] sm:$0xff]  }
 0x14a   : > { %v295_v28 = vmax.f32 %v291_v25, 0.0 }
 0x14c   : > { %v312_v29 = vpack.c.bf16 %v295_v28, %v294_v27 }
 0x14e   : > { %1598 = vmatmul.mubr.bf16.vlgmr.msra.gmra.mrb[0].mxu1 %v312_v29 }
 0x14f   : > { %1629 = vmatprep.mubr.msk.bf16.mxu1 %vm1951_vm0, %v1950_v0  ;;  %1622 = vmatpush3.bf16.msra.mxu1 %v1795_v32  ;;  %v1489_v32 = vld [vmem:[#allocation6 + $0x6] ss:$0 sm:$0xff] }
 0x150   : > { %1623 = vmatprep.subr.bf16.mxu1 %v1950_v0 }
 0x153   : > { %1624 = vmatpush3.bf16.msra.mxu1 %v1796_v33 }
 0x154   : > { %1625 = vmatprep.subr.bf16.mxu1 %v1950_v0 }
 0x157   : > { %1626 = vmatpush3.bf16.msra.mxu1 %v1797_v44 }
 0x158   : > { %1627 = vmatprep.subr.bf16.mxu1 %v1950_v0 }
 0x15b   : > { %1628 = vmatpush3.bf16.msra.mxu1 %v1798_v45 }
 0x15c   : > { %1645 = vmatprep.subr.bf16.mxu1 %v1950_v0 }
 0x221   : > { %v403_v35 = vpop.f32.mrb[0].mxu1 }
 0x222   : > { %v404_v36 = vadd.f32 %v1455_v34, %v403_v35  ;;  %v1599_v37 = vpop.f32.mrb[1].mxu1 }
 0x223   : > { %v406_v38 = vpop.f32.mrb[2].mxu1 }
 0x224   : > { %v407_v39 = vadd.f32 %v1455_v34, %v406_v38  ;;  %v1600_v40 = vpop.f32.mrb[3].mxu1  ;;  %v410_v41 = vmax.f32 %v404_v36, 0.0 }
 0x226   : > { %v411_v42 = vmax.f32 %v407_v39, 0.0 }
 0x228   : > { %v428_v43 = vpack.c.bf16 %v411_v42, %v410_v41  ;;  %v1808_v42 = vld [vmem:[#allocation4 + $0xf8] sm:$0xff]  }
 0x22a   : > { %1618 = vmatmul.mubr.bf16.vlgmr.msra.gmra.mrb[4].mxu0 %v428_v43  ;;  %v1493_v43 = vld [vmem:[#allocation6 + $0x7] ss:$0 sm:$0xff] }
 0x22b   : > { %1641 = vmatprep.mubr.msk.bf16.mxu0 %vm1951_vm0, %v1950_v0  ;;  %1634 = vmatpush3.bf16.msra.mxu0 %v1799_v46 }
 0x22c   : > { %1635 = vmatprep.subr.bf16.mxu0 %v1950_v0 }
 0x22f   : > { %1636 = vmatpush3.bf16.msra.mxu0 %v1800_v47 }
 0x230   : > { %1637 = vmatprep.subr.bf16.mxu0 %v1950_v0 }
 0x233   : > { %1638 = vmatpush3.bf16.msra.mxu0 %v1801_v58 }
 0x234   : > { %1639 = vmatprep.subr.bf16.mxu0 %v1950_v0 }
 0x237   : > { %1640 = vmatpush3.bf16.msra.mxu0 %v1802_v59 }
 0x238   : > { %1653 = vmatprep.subr.bf16.mxu0 %v1950_v0 }
 0x2fd   : > { %v519_v49 = vpop.f32.mrb[4].mxu0 }
 0x2fe   : > { %v520_v50 = vadd.f32 %v1464_v48, %v519_v49  ;;  %v1619_v51 = vpop.f32.mrb[5].mxu0 }
 0x2ff   : > { %v522_v52 = vpop.f32.mrb[6].mxu0 }
 0x300   : > { %v523_v53 = vadd.f32 %v1464_v48, %v522_v52  ;;  %v1620_v54 = vpop.f32.mrb[7].mxu0  ;;  %v526_v55 = vmax.f32 %v520_v50, 0.0 }
 0x301   : > { %v1496_v54 = vld [vmem:[#allocation6 + $0x8] ss:$0 sm:$0xff] }
 0x302   : > { %v527_v56 = vmax.f32 %v523_v53, 0.0  ;;  %v1809_v53 = vld [vmem:[#allocation4 + $0x100] sm:$0xff]  }
 0x304   : > { %v536_v57 = vpack.c.bf16 %v527_v56, %v526_v55 }
 0x306   : > { %1630 = vmatmul.mubr.msk.bf16.vlgmr.msra.gmra.mrb[4].mxu1 %vm569_vm2, %v536_v57 }
 0x307   : > { %1649 = vmatprep.mubr.msk.bf16.mxu1 %vm1951_vm0, %v1950_v0  ;;  %1646 = vmatpush3.bf16.msra.mxu1 %v1803_v7 }
 0x308   : > { %1647 = vmatprep.subr.bf16.mxu1 %v1950_v0 }
 0x30b   : > { %1648 = vmatpush3.bf16.msra.mxu1 %v1804_v8 }
 0x30c   : > { %1661 = vmatprep.subr.bf16.mxu1 %v1950_v0 }
 0x3d9   : > { %v607_v61 = vpop.f32.mrb[4].mxu1 }
 0x3da   : > { %v608_v62 = vadd.f32 %v1473_v60, %v607_v61  ;;  %v1631_v63 = vpop.f32.mrb[5].mxu1 }
 0x3db   : > { %v610_v1 = vpop.f32.mrb[6].mxu1 }
 0x3dc   : > { %v611_v2 = vadd.f32 %v1473_v60, %v610_v1  ;;  %v1632_v3 = vpop.f32.mrb[7].mxu1  ;;  %v614_v4 = vmax.f32 %v608_v62, 0.0  ;;  %v1810_v1 = vld [vmem:[#allocation4 + $0x108] sm:$0xff]  }
 0x3de   : > { %v615_v5 = vmax.f32 %v611_v2, 0.0  ;;  %v1499_v2 = vld [vmem:[#allocation6 + $0x9] ss:$0 sm:$0xff] }
 0x3e0   : > { %v624_v6 = vpack.c.bf16 %v615_v5, %v614_v4 }
 0x3e2   : > { %1642 = vmatmul.mubr.msk.bf16.vlgmr.msra.gmra.mrb[8].mxu0 %vm569_vm2, %v624_v6 }
 0x3e3   : > { %1657 = vmatprep.mubr.msk.bf16.mxu0 %vm1951_vm0, %v1950_v0  ;;  %1654 = vmatpush3.bf16.msra.mxu0 %v1805_v19 }
 0x3e4   : > { %1655 = vmatprep.subr.bf16.mxu0 %v1950_v0 }
 0x3e7   : > { %1656 = vmatpush3.bf16.msra.mxu0 %v1806_v20 }
 0x3e8   : > { %1667 = vmatprep.subr.bf16.mxu0 %v1950_v0 }
 0x4b5   : > { %v694_v10 = vpop.f32.mrb[8].mxu0 }
 0x4b6   : > { %v695_v11 = vadd.f32 %v1479_v9, %v694_v10  ;;  %v1643_v12 = vpop.f32.mrb[9].mxu0 }
 0x4b7   : > { %v697_v13 = vpop.f32.mrb[10].mxu0  ;;  %v1811_v12 = vld [vmem:[#allocation4 + $0x110] sm:$0xff]  }
 0x4b8   : > { %v698_v14 = vadd.f32 %v1479_v9, %v697_v13  ;;  %v1644_v15 = vpop.f32.mrb[11].mxu0  ;;  %v701_v16 = vmax.f32 %v695_v11, 0.0  ;;  %v1502_v13 = vld [vmem:[#allocation6 + $0xa] ss:$0 sm:$0xff] }
 0x4ba   : > { %v702_v17 = vmax.f32 %v698_v14, 0.0 }
 0x4bc   : > { %v707_v18 = vpack.c.bf16 %v702_v17, %v701_v16 }
 0x4be   : > { %1650 = vmatmul.mubr.msk.bf16.vlgmr.msra.gmra.mrb[8].mxu1 %vm249_vm1, %v707_v18 }
 0x4bf   : > { %1663 = vmatprep.mubr.msk.bf16.mxu1 %vm1951_vm0, %v1950_v0  ;;  %1662 = vmatpush3.bf16.msra.mxu1 %v1807_v31 }
 0x4c0   : > { %1673 = vmatprep.subr.bf16.mxu1 %v1950_v0 }
 0x591   : > { %v765_v22 = vpop.f32.mrb[8].mxu1 }
 0x592   : > { %v766_v23 = vadd.f32 %v1485_v21, %v765_v22  ;;  %v1651_v24 = vpop.f32.mrb[9].mxu1 }
 0x593   : > { %v768_v25 = vpop.f32.mrb[10].mxu1  ;;  %v1505_v24 = vld [vmem:[#allocation6 + $0xb] ss:$0 sm:$0xff] }
 0x594   : > { %v769_v26 = vadd.f32 %v1485_v21, %v768_v25  ;;  %v1652_v27 = vpop.f32.mrb[11].mxu1  ;;  %v772_v28 = vmax.f32 %v766_v23, 0.0  ;;  %v1812_v23 = vld [vmem:[#allocation4 + $0x118] sm:$0xff]  }
 0x596   : > { %v773_v29 = vmax.f32 %v769_v26, 0.0 }
 0x598   : > { %v778_v30 = vpack.c.bf16 %v773_v29, %v772_v28 }
 0x59a   : > { %1658 = vmatmul.mubr.msk.bf16.vlgmr.msra.gmra.mrb[12].mxu0 %vm249_vm1, %v778_v30 }
 0x59b   : > { %1669 = vmatprep.mubr.msk.bf16.mxu0 %vm1951_vm0, %v1950_v0  ;;  %1668 = vmatpush3.bf16.msra.mxu0 %v1808_v42 }
 0x59c   : > { %1679 = vmatprep.subr.bf16.mxu0 %v1950_v0 }
 0x66d   : > { %v836_v33 = vpop.f32.mrb[12].mxu0 }
 0x66e   : > { %v837_v34 = vadd.f32 %v1489_v32, %v836_v33  ;;  %v1659_v35 = vpop.f32.mrb[13].mxu0 }
 0x66f   : > { %v839_v36 = vpop.f32.mrb[14].mxu0  ;;  %v1508_v35 = vld [vmem:[#allocation6 + $0xc] ss:$0 sm:$0xff] }
 0x670   : > { %v840_v37 = vadd.f32 %v1489_v32, %v839_v36  ;;  %v1660_v38 = vpop.f32.mrb[15].mxu0  ;;  %v843_v39 = vmax.f32 %v837_v34, 0.0  ;;  %v1813_v34 = vld [vmem:[#allocation4 + $0x120] sm:$0xff]  }
 0x672   : > { %v844_v40 = vmax.f32 %v840_v37, 0.0 }
 0x674   : > { %v847_v41 = vpack.c.bf16 %v844_v40, %v843_v39 }
 0x676   : > { %1664 = vmatmul.mubr.msk.bf16.vlgmr.msra.gmra.mrb[12].mxu1 %vm862_vm3, %v847_v41 }
 0x677   : > { %1675 = vmatprep.mubr.msk.bf16.mxu1 %vm1951_vm0, %v1950_v0  ;;  %1674 = vmatpush3.bf16.msra.mxu1 %v1809_v53 }
 0x678   : > { %1685 = vmatprep.subr.bf16.mxu1 %v1950_v0 }
 0x749   : > { %v900_v44 = vpop.f32.mrb[12].mxu1 }
 0x74a   : > { %v901_v45 = vadd.f32 %v1493_v43, %v900_v44  ;;  %v1665_v46 = vpop.f32.mrb[13].mxu1 }
 0x74b   : > { %v903_v47 = vpop.f32.mrb[14].mxu1  ;;  %v1511_v46 = vld [vmem:[#allocation6 + $0xd] ss:$0 sm:$0xff] }
 0x74c   : > { %v904_v48 = vadd.f32 %v1493_v43, %v903_v47  ;;  %v1666_v49 = vpop.f32.mrb[15].mxu1  ;;  %v907_v50 = vmax.f32 %v901_v45, 0.0  ;;  %v1814_v45 = vld [vmem:[#allocation4 + $0x128] sm:$0xff]  }
 0x74e   : > { %v908_v51 = vmax.f32 %v904_v48, 0.0 }
 0x750   : > { %v911_v52 = vpack.c.bf16 %v908_v51, %v907_v50 }
 0x752   : > { %1670 = vmatmul.mubr.msk.bf16.vlgmr.msra.gmra.mrb[16].mxu0 %vm862_vm3, %v911_v52 }
 0x753   : > { %1681 = vmatprep.mubr.msk.bf16.mxu0 %vm1951_vm0, %v1950_v0  ;;  %1680 = vmatpush3.bf16.msra.mxu0 %v1810_v1 }
 0x754   : > { %1691 = vmatprep.subr.bf16.mxu0 %v1950_v0 }
 0x825   : > { %v963_v55 = vpop.f32.mrb[16].mxu0 }
 0x826   : > { %v964_v56 = vadd.f32 %v1496_v54, %v963_v55  ;;  %v1671_v57 = vpop.f32.mrb[17].mxu0  ;;  %v1514_v55 = vld [vmem:[#allocation6 + $0xe] ss:$0 sm:$0xff] }
 0x827   : > { %v966_v58 = vpop.f32.mrb[18].mxu0 }
 0x828   : > { %v967_v59 = vadd.f32 %v1496_v54, %v966_v58  ;;  %v1672_v60 = vpop.f32.mrb[19].mxu0  ;;  %v970_v61 = vmax.f32 %v964_v56, 0.0 }
 0x82a   : > { %v971_v62 = vmax.f32 %v967_v59, 0.0 }
 0x82c   : > { %v974_v63 = vpack.c.bf16 %v971_v62, %v970_v61 }
 0x82e   : > { %1676 = vmatmul.mubr.msk.bf16.vlgmr.msra.gmra.mrb[16].mxu1 %vm862_vm3, %v974_v63 }
 0x82f   : > { %1687 = vmatprep.mubr.msk.bf16.mxu1 %vm1951_vm0, %v1950_v0  ;;  %1686 = vmatpush3.bf16.msra.mxu1 %v1811_v12 }
 0x830   : > { %1697 = vmatprep.subr.bf16.mxu1 %v1950_v0 }
 0x901   : > { %v1026_v3 = vpop.f32.mrb[16].mxu1 }
 0x902   : > { %v1027_v4 = vadd.f32 %v1499_v2, %v1026_v3  ;;  %v1677_v5 = vpop.f32.mrb[17].mxu1 }
 0x903   : > { %v1029_v6 = vpop.f32.mrb[18].mxu1 }
 0x904   : > { %v1030_v7 = vadd.f32 %v1499_v2, %v1029_v6  ;;  %v1678_v8 = vpop.f32.mrb[19].mxu1  ;;  %v1033_v9 = vmax.f32 %v1027_v4, 0.0 }
 0x906   : > { %v1034_v10 = vmax.f32 %v1030_v7, 0.0 }
 0x908   : > { %v1037_v11 = vpack.c.bf16 %v1034_v10, %v1033_v9 }
 0x90a   : > { %1682 = vmatmul.mubr.msk.bf16.vlgmr.msra.gmra.mrb[20].mxu0 %vm862_vm3, %v1037_v11 }
 0x90b   : > { %1693 = vmatprep.mubr.msk.bf16.mxu0 %vm1951_vm0, %v1950_v0  ;;  %1692 = vmatpush3.bf16.msra.mxu0 %v1812_v23 }
 0x90c   : > { %1703 = vmatprep.subr.bf16.mxu0 %v1950_v0 }
 0x9dd   : > { %v1089_v14 = vpop.f32.mrb[20].mxu0 }
 0x9de   : > { %v1090_v15 = vadd.f32 %v1502_v13, %v1089_v14  ;;  %v1683_v16 = vpop.f32.mrb[21].mxu0 }
 0x9df   : > { %v1092_v17 = vpop.f32.mrb[22].mxu0 }
 0x9e0   : > { %v1093_v18 = vadd.f32 %v1502_v13, %v1092_v17  ;;  %v1684_v19 = vpop.f32.mrb[23].mxu0  ;;  %v1096_v20 = vmax.f32 %v1090_v15, 0.0 }
 0x9e2   : > { %v1097_v21 = vmax.f32 %v1093_v18, 0.0 }
 0x9e4   : > { %v1100_v22 = vpack.c.bf16 %v1097_v21, %v1096_v20 }
 0x9e6   : > { %1688 = vmatmul.mubr.msk.bf16.vlgmr.msra.gmra.mrb[20].mxu1 %vm862_vm3, %v1100_v22 }
 0x9e7   : > { %1699 = vmatprep.mubr.msk.bf16.mxu1 %vm1951_vm0, %v1950_v0  ;;  %1698 = vmatpush3.bf16.msra.mxu1 %v1813_v34 }
 0xab9   : > { %v1152_v25 = vpop.f32.mrb[20].mxu1 }
 0xaba   : > { %v1153_v26 = vadd.f32 %v1505_v24, %v1152_v25  ;;  %v1689_v27 = vpop.f32.mrb[21].mxu1 }
 0xabb   : > { %v1155_v28 = vpop.f32.mrb[22].mxu1 }
 0xabc   : > { %v1156_v29 = vadd.f32 %v1505_v24, %v1155_v28  ;;  %v1690_v30 = vpop.f32.mrb[23].mxu1  ;;  %v1159_v31 = vmax.f32 %v1153_v26, 0.0 }
 0xabe   : > { %v1160_v32 = vmax.f32 %v1156_v29, 0.0 }
 0xac0   : > { %v1163_v33 = vpack.c.bf16 %v1160_v32, %v1159_v31 }
 0xac2   : > { %1694 = vmatmul.mubr.msk.bf16.vlgmr.msra.gmra.mrb[24].mxu0 %vm862_vm3, %v1163_v33 }
 0xac3   : > { %1705 = vmatprep.mubr.msk.bf16.mxu0 %vm1951_vm0, %v1950_v0  ;;  %1704 = vmatpush3.bf16.msra.mxu0 %v1814_v45 }
 0xb95   : > { %v1215_v36 = vpop.f32.mrb[24].mxu0 }
 0xb96   : > { %v1216_v37 = vadd.f32 %v1508_v35, %v1215_v36  ;;  %v1695_v38 = vpop.f32.mrb[25].mxu0 }
 0xb97   : > { %v1218_v39 = vpop.f32.mrb[26].mxu0 }
 0xb98   : > { %v1219_v40 = vadd.f32 %v1508_v35, %v1218_v39  ;;  %v1696_v41 = vpop.f32.mrb[27].mxu0  ;;  %v1222_v42 = vmax.f32 %v1216_v37, 0.0 }
 0xb9a   : > { %v1223_v43 = vmax.f32 %v1219_v40, 0.0 }
 0xb9c   : > { %v1226_v44 = vpack.c.bf16 %v1223_v43, %v1222_v42 }
 0xb9e   : > { %1700 = vmatmul.mubr.msk.bf16.vlgmr.msra.gmra.mrb[24].mxu1 %vm862_vm3, %v1226_v44 }
 0xc71   : > { %v1278_v47 = vpop.f32.mrb[24].mxu1 }
 0xc72   : > { %v1279_v0 = vadd.f32 %v1511_v46, %v1278_v47  ;;  %v1701_v48 = vpop.f32.mrb[25].mxu1 }
 0xc73   : > { %v1281_v49 = vpop.f32.mrb[26].mxu1 }
 0xc74   : > { %v1282_v50 = vadd.f32 %v1511_v46, %v1281_v49  ;;  %v1702_v51 = vpop.f32.mrb[27].mxu1  ;;  %v1285_v52 = vmax.f32 %v1279_v0, 0.0 }
 0xc76   : > { %v1286_v53 = vmax.f32 %v1282_v50, 0.0 }
 0xc78   : > { %v1289_v54 = vpack.c.bf16 %v1286_v53, %v1285_v52 }
 0xc7a   : > { %1706 = vmatmul.mubr.msk.bf16.vlgmr.msra.gmra.mrb[28].mxu0 %vm862_vm3, %v1289_v54 }
 0xd4d   : > { %v1341_v56 = vpop.f32.mrb[28].mxu0 }
 0xd4e   : > { %v1342_v57 = vadd.f32 %v1514_v55, %v1341_v56  ;;  %v1707_v58 = vpop.f32.mrb[29].mxu0 }
 0xd4f   : > { %v1344_v59 = vpop.f32.mrb[30].mxu0 }
 0xd50   : > { %1348 = vst [vmem:[%s220_s23] sm:$0xff] %v1342_v57  ;;  %v1345_v60 = vadd.f32 %v1514_v55, %v1344_v59  ;;  %v1708_v61 = vpop.f32.mrb[31].mxu0 }
 0xd52   : > { %1349 = vst [vmem:[%s220_s23 + $0x8] sm:$0xff] %v1345_v60 }
 0xd53 PF: > { %p14_p6 = scmp.ge.s32.totalorder %s2069_s5, 4   ;;  %s2248_s12 = smov %s1931_s13 }
 0xd54   : > { %s2249_s13 = smov %s1935_s14  ;;  %s2250_s14 = smov %s2078_s8 }
 0xd55   : > { %s2251_s15 = smov %s2069_s5  ;;  %16 = sbr.rel (!%p14_p6) target bundleno = 4 (0x4), region = 94 }
 0xd5c   :  { %1372 = vsyncpa [#allocation3], 1 }
 0xd5d   :  { %1374 = vsyncpa [#allocation3 + $0x1], 1 }
 0xd5e   :  { %1375 = vsyncpa [#allocation5], 1 }

</bundles_post_ra>
